<compile_context>
chip_gen: v5e
topology: v5e:2x2
jax: 0.10.0
libtpu: 0.0.40
codegen_flags: <defaults>
</compile_context>

<pallas_src>
import functools
import math

import jax
import jax.numpy as jnp
from jax.experimental import pallas as pl
from jax.experimental.pallas import tpu as pltpu


def _round_up(x: int, m: int) -> int:
    return ((x + m - 1) // m) * m


def _qkv_fused_kernel(x_ref, w_ref, b_ref, out_ref, acc_ref):
    """out = x @ [Wq|Wk|Wv] + [bq|bk|bv], accumulated in f32 across the k grid axis."""
    k = pl.program_id(1)

    @pl.when(k == 0)
    def _():
        acc_ref[...] = jnp.zeros_like(acc_ref)

    acc_ref[...] += jnp.dot(
        x_ref[...], w_ref[...], preferred_element_type=jnp.float32)

    @pl.when(k == pl.num_programs(1) - 1)
    def _():
        # Bias add + downcast only once, after the full contraction.
        out_ref[...] = (acc_ref[...] + b_ref[...]).astype(out_ref.dtype)


@functools.partial(jax.jit, static_argnames=("compute_dtype", "tm"))
def qkv_map(x, wq, wk, wv, bq, bk, bv, *, compute_dtype=jnp.bfloat16, tm=256):
    """Pallas QKVmap forward.

    x: (..., S, F)
    wq/wk/wv: (F, Q)/(F, K)/(F, V);  bq/bk/bv: broadcastable to (1, Q)/(1, K)/(1, V)
    returns (..., S, Q), (..., S, K), (..., S, V) in x.dtype
    """
    *lead, F = x.shape
    M = math.prod(lead) if lead else 1
    Q, K, V = wq.shape[1], wk.shape[1], wv.shape[1]
    N = Q + K + V
    out_dtype = x.dtype

    # ---- Fuse the three projections into one lane-dense matmul -------------
    w = jnp.concatenate([wq, wk, wv], axis=1)                      # (F, N)
    b = jnp.concatenate(
        [bq.reshape(1, Q), bk.reshape(1, K), bv.reshape(1, V)], axis=1)  # (1, N)

    # Pad fused output features to a multiple of 128 lanes (unmasked vst,
    # full MXU column utilization).  Zero-padded weight/bias columns produce
    # zeros that are sliced off afterwards.
    N_pad = _round_up(N, 128)
    if N_pad != N:
        w = jnp.pad(w, ((0, 0), (0, N_pad - N)))
        b = jnp.pad(b, ((0, 0), (0, N_pad - N)))

    # ---- Row tiling ---------------------------------------------------------
    x2 = x.reshape(M, F)
    tm_eff = min(tm, _round_up(M, 8))          # multiple of 8 sublanes
    M_pad = _round_up(M, tm_eff)
    if M_pad != M:
        x2 = jnp.pad(x2, ((0, M_pad - M), (0, 0)))

    # ---- Contraction tiling (only needed for large F) -----------------------
    if F <= 512:
        tk, F_pad = F, F                        # single k step, F block == full dim
    else:
        tk = 512                                # multiple of 128
        F_pad = _round_up(F, tk)
    if F_pad != F:
        x2 = jnp.pad(x2, ((0, 0), (0, F_pad - F)))
        w = jnp.pad(w, ((0, F_pad - F), (0, 0)))

    # ---- Operand dtypes: bf16 into the MXU, f32 accumulation / bias ---------
    x2 = x2.astype(compute_dtype)
    w = w.astype(compute_dtype)
    b = b.astype(jnp.float32)

    grid = (M_pad // tm_eff, F_pad // tk)

    # Advisory cost model for the XLA scheduler.
    itemsize_in = jnp.dtype(compute_dtype).itemsize
    itemsize_out = jnp.dtype(out_dtype).itemsize
    cost = pl.CostEstimate(
        flops=2 * M_pad * F_pad * N_pad,
        transcendentals=0,
        bytes_accessed=(M_pad * F_pad * itemsize_in      # x
                        + F_pad * N_pad * itemsize_in    # fused weights
                        + N_pad * 4                      # bias
                        + M_pad * N_pad * itemsize_out), # output slab
    )

    # VMEM budget: double-buffered x/w/out tiles + f32 accumulator + bias.
    vmem_need = (2 * (tm_eff * tk + tk * N_pad) * itemsize_in
                 + 2 * tm_eff * N_pad * itemsize_out
                 + tm_eff * N_pad * 4
                 + N_pad * 4)
    vmem_limit = min(2 * vmem_need + (2 << 20), 64 * 1024 * 1024)

    out = pl.pallas_call(
        _qkv_fused_kernel,
        out_shape=jax.ShapeDtypeStruct((M_pad, N_pad), out_dtype),
        grid_spec=pltpu.PrefetchScalarGridSpec(
            num_scalar_prefetch=0,
            grid=grid,
            in_specs=[
                pl.BlockSpec((tm_eff, tk), lambda i, k: (i, k)),   # x rows
                pl.BlockSpec((tk, N_pad), lambda i, k: (k, 0)),    # fused weights (const in i)
                pl.BlockSpec((1, N_pad), lambda i, k: (0, 0)),     # bias, resident
            ],
            out_specs=pl.BlockSpec((tm_eff, N_pad), lambda i, k: (i, 0)),
            scratch_shapes=[pltpu.VMEM((tm_eff, N_pad), jnp.float32)],
        ),
        compiler_params=pltpu.CompilerParams(
            dimension_semantics=("parallel", "arbitrary"),
            vmem_limit_bytes=vmem_limit,
        ),
        cost_estimate=cost,
    )(x2, w, b)

    q = out[:M, :Q].reshape(*lead, Q)
    k = out[:M, Q:Q + K].reshape(*lead, K)
    v = out[:M, Q + K:Q + K + V].reshape(*lead, V)
    return q, k, v


if __name__ == "__main__":
    # Module hyperparameters (consistent with QKVmap.__init__ semantics):
    input_features = 32
    q_features = 32
    k_features = 16          # defaults to q_features if None
    v_features = 16          # defaults to k_features if None

    batch, seq = 2, 8
    dtype = jnp.float32

    key = jax.random.PRNGKey(0)
    kx, kq, kk, kv, kbq, kbk, kbv = jax.random.split(key, 7)

    x = jax.random.normal(kx, (batch, seq, input_features), dtype=dtype)

    # Deterministic synthetic parameters (nn.Linear-style, stored transposed
    # as (in, out) for a row-major matmul).
    scale = 1.0 / jnp.sqrt(jnp.asarray(input_features, dtype))
    wq = jax.random.normal(kq, (input_features, q_features), dtype=dtype) * scale
    wk = jax.random.normal(kk, (input_features, k_features), dtype=dtype) * scale
    wv = jax.random.normal(kv, (input_features, v_features), dtype=dtype) * scale
    bq = jax.random.normal(kbq, (1, q_features), dtype=dtype) * 0.01
    bk = jax.random.normal(kbk, (1, k_features), dtype=dtype) * 0.01
    bv = jax.random.normal(kbv, (1, v_features), dtype=dtype) * 0.01

    q, k, v = qkv_map(x, wq, wk, wv, bq, bk, bv)
    jax.block_until_ready((q, k, v))

    assert q.shape == (batch, seq, q_features)
    assert k.shape == (batch, seq, k_features)
    assert v.shape == (batch, seq, v_features)

    # Tight check against a reference that mimics the kernel's numerics
    # (bf16 operands, f32 accumulation, f32 bias add).
    xb = x.astype(jnp.bfloat16).astype(jnp.float32)
    wqb = wq.astype(jnp.bfloat16).astype(jnp.float32)
    wkb = wk.astype(jnp.bfloat16).astype(jnp.float32)
    wvb = wv.astype(jnp.bfloat16).astype(jnp.float32)
    assert jnp.allclose(q, xb @ wqb + bq, atol=1e-4, rtol=1e-4)
    assert jnp.allclose(k, xb @ wkb + bk, atol=1e-4, rtol=1e-4)
    assert jnp.allclose(v, xb @ wvb + bv, atol=1e-4, rtol=1e-4)

    # Looser check against the full-precision PyTorch-equivalent forward.
    assert jnp.allclose(q, x @ wq + bq, atol=3e-2, rtol=3e-2)
    assert jnp.allclose(k, x @ wk + bk, atol=3e-2, rtol=3e-2)
    assert jnp.allclose(v, x @ wv + bv, atol=3e-2, rtol=3e-2)

    print("KERNEL_OK")
</pallas_src>

<mosaic_0001>
module attributes {stable_mosaic.version = 11 : i64} {
  func.func @_qkv_fused_kernel(%arg0: i32, %arg1: i32, %arg2: memref<16x32xbf16, #tpu.memory_space<vmem>>, %arg3: memref<32x128xbf16, #tpu.memory_space<vmem>>, %arg4: memref<1x128xf32, #tpu.memory_space<vmem>>, %arg5: memref<16x128xf32, #tpu.memory_space<vmem>>, %arg6: memref<16x128xf32, #tpu.memory_space<vmem>>) attributes {dimension_semantics = [#tpu.dimension_semantics<parallel>, #tpu.dimension_semantics<arbitrary>], iteration_bounds = array<i64: 1, 1>, scalar_prefetch = 0 : i64, scratch_operands = 1 : i64, tpu.core_type = #tpu.core_type<tc>, window_params = [{transform_indices = @transform_0, window_bounds = array<i64: 16, 32>}, {transform_indices = @transform_1, window_bounds = array<i64: 32, 128>}, {pipeline_mode = #tpu.pipeline_mode<synchronous>, transform_indices = @transform_2, window_bounds = array<i64: 1, 128>}, {transform_indices = @transform_3, window_bounds = array<i64: 16, 128>}]} {
    %c0_i32 = arith.constant 0 : i32
    %0 = arith.cmpi eq, %arg1, %c0_i32 : i32
    %1 = arith.extui %0 : i1 to i32
    %c0_i32_0 = arith.constant 0 : i32
    %2 = arith.cmpi ne, %1, %c0_i32_0 : i32
    scf.if %2 {
      %cst_10 = arith.constant 0.000000e+00 : f32
      %12 = vector.broadcast %cst_10 : f32 to vector<16x128xf32>
      %c0_11 = arith.constant 0 : index
      %c0_12 = arith.constant 0 : index
      %13 = vector.load %arg6[%c0_11, %c0_12] : memref<16x128xf32, #tpu.memory_space<vmem>>, vector<16x128xf32>
      tpu.vector_store %arg6[%c0_11, %c0_12], %12 {strides = array<i32>} : memref<16x128xf32, #tpu.memory_space<vmem>>, vector<16x128xf32>,
    } else {
    }
    %c0 = arith.constant 0 : index
    %c0_1 = arith.constant 0 : index
    %3 = vector.load %arg6[%c0, %c0_1] : memref<16x128xf32, #tpu.memory_space<vmem>>, vector<16x128xf32>
    %c0_2 = arith.constant 0 : index
    %c0_3 = arith.constant 0 : index
    %4 = vector.load %arg2[%c0_2, %c0_3] : memref<16x32xbf16, #tpu.memory_space<vmem>>, vector<16x32xbf16>
    %c0_4 = arith.constant 0 : index
    %c0_5 = arith.constant 0 : index
    %5 = vector.load %arg3[%c0_4, %c0_5] : memref<32x128xbf16, #tpu.memory_space<vmem>>, vector<32x128xbf16>
    %cst = arith.constant dense<0.000000e+00> : vector<16x128xf32>
    %6 = tpu.matmul %4, %5, %cst {dimension_numbers = #tpu.dot_dimension_numbers<[1], [0], [0], [1], [0, 0, 1, 1], [], []>} : vector<16x32xbf16>, vector<32x128xbf16>, vector<16x128xf32> -> vector<16x128xf32>
    %7 = arith.addf %3, %6 : vector<16x128xf32>
    %c0_6 = arith.constant 0 : index
    %c0_7 = arith.constant 0 : index
    %8 = vector.load %arg6[%c0_6, %c0_7] : memref<16x128xf32, #tpu.memory_space<vmem>>, vector<16x128xf32>
    tpu.vector_store %arg6[%c0_6, %c0_7], %7 {strides = array<i32>} : memref<16x128xf32, #tpu.memory_space<vmem>>, vector<16x128xf32>,
    %c0_i32_8 = arith.constant 0 : i32
    %9 = arith.cmpi eq, %arg1, %c0_i32_8 : i32
    %10 = arith.extui %9 : i1 to i32
    %c0_i32_9 = arith.constant 0 : i32
    %11 = arith.cmpi ne, %10, %c0_i32_9 : i32
    scf.if %11 {
      %c0_10 = arith.constant 0 : index
      %c0_11 = arith.constant 0 : index
      %12 = vector.load %arg6[%c0_10, %c0_11] : memref<16x128xf32, #tpu.memory_space<vmem>>, vector<16x128xf32>
      %c0_12 = arith.constant 0 : index
      %c0_13 = arith.constant 0 : index
      %13 = vector.load %arg4[%c0_12, %c0_13] : memref<1x128xf32, #tpu.memory_space<vmem>>, vector<1x128xf32>
      %14 = vector.broadcast %13 : vector<1x128xf32> to vector<16x128xf32>
      %15 = arith.addf %12, %14 : vector<16x128xf32>
      %c0_14 = arith.constant 0 : index
      %c0_15 = arith.constant 0 : index
      %16 = vector.load %arg5[%c0_14, %c0_15] : memref<16x128xf32, #tpu.memory_space<vmem>>, vector<16x128xf32>
      tpu.vector_store %arg5[%c0_14, %c0_15], %15 {strides = array<i32>} : memref<16x128xf32, #tpu.memory_space<vmem>>, vector<16x128xf32>,
    } else {
    }
    return
  }
  func.func @transform_0(%arg0: i32, %arg1: i32) -> (i32, i32) {
    %c0_i32 = arith.constant 0 : i32
    return %arg0, %arg1 : i32, i32
  }
  func.func @transform_1(%arg0: i32, %arg1: i32) -> (i32, i32) {
    %c0_i32 = arith.constant 0 : i32
    %c0_i32_0 = arith.constant 0 : i32
    return %arg1, %c0_i32 : i32, i32
  }
  func.func @transform_2(%arg0: i32, %arg1: i32) -> (i32, i32) {
    %c0_i32 = arith.constant 0 : i32
    %c0_i32_0 = arith.constant 0 : i32
    %c0_i32_1 = arith.constant 0 : i32
    return %c0_i32, %c0_i32_0 : i32, i32
  }
  func.func @transform_3(%arg0: i32, %arg1: i32) -> (i32, i32) {
    %c0_i32 = arith.constant 0 : i32
    %c0_i32_0 = arith.constant 0 : i32
    return %arg0, %c0_i32 : i32, i32
  }
}

</mosaic_0001>

<bundles_post_ra>
// kernel: qkv_map.1
= control target key start
LH: loop header
LB: loop body
LE: loop exit
PB: predicated region body
PF: predicated region fallthrough
CT: control target
= control target key end

     0   :  { %vm46_vm0 = vcmask 261120   ;;  %s140_s1 = inlined_call_operand.vmem [shape: bf16[32,128], index: 1, kind: input, shape index: {}]   ;;  %s141_s2 = inlined_call_operand.vmem [shape: f32[1,128], index: 2, kind: input, shape index: {}]   ;;  %s142_s0 = inlined_call_operand.vmem [shape: bf16[16,32], index: 0, kind: input, shape index: {}]   ;;  %s143_s3 = inlined_call_operand.vmem [shape: f32[16,128], index: 3, kind: output, shape index: {}]  }
   0x1   :  { %v100_v0 = vld [vmem:[%s140_s1 + $0x8] sm:$0xff]  ;;  %v99_v1 = vld [vmem:[%s140_s1] sm:$0xff] }
   0x2   :  { %56 = vmatpush.bf16.msra.mxu0 %v100_v0  ;;  %v98_v2 = vld [vmem:[%s142_s0] sm:$0xff] }
   0x3   :  { %v101_v3 = vld [vmem:[%s141_s2] ss:$0 sm:$0xff] }
   0x6   :  { %57 = vmatpush.bf16.msra.mxu0 %v99_v1 }
   0x9   :  { %97 = vmatmul.msk.bf16.vlgmr.msra.gmra.mxu0 %vm46_vm0, %v98_v2 }
  0x86   :  { %v59_v4 = vpop.f32.mrf.mxu0 }
  0x87   :  { %v77_v5 = vadd.f32 %v101_v3, %v59_v4 }
  0x89   :  { %79 = vst [vmem:[%s143_s3] sm:$0xff] %v77_v5 }
  0x8e   :  { %v61_v6 = vpop.f32.mrf.mxu0 }
  0x8f   :  { %v78_v7 = vadd.f32 %v101_v3, %v61_v6 }
  0x91   :  { %80 = vst [vmem:[%s143_s3 + $0x8] sm:$0xff] %v78_v7 }

</bundles_post_ra>
